<compile_context>
chip_gen: v7x
topology: tpu7x:2x2x1
jax: 0.10.0
libtpu: 0.0.40
codegen_flags: <defaults>
</compile_context>

<pallas_src>
import numpy as np
import jax
import jax.numpy as jnp
from jax.experimental import pallas as pl
from jax.experimental.pallas import tpu as pltpu

RAW, FEAT, HID, PRED_HID = 200, 60, 22, 30   # module defaults


def _round_up(a, m):
    return ((a + m - 1) // m) * m


def _pick_blocks(B, n_aligned, itemsize, target_bytes):
    """Choose (block_b, block_n) from a VMEM budget that accounts for N.

    Target ~2-4 MiB per x block (measured DMA sweet spot), keep both block dims
    multiples of 8 (layout-preserving reshapes), and cap block_b so big batches
    still give >=2 (ideally >=4) grid steps along the 'parallel' axis so v7x's
    two TensorCores both get work.
    """
    row_bytes = RAW * itemsize
    if 8 * n_aligned * row_bytes <= target_bytes:
        block_n = n_aligned
        block_b = max(8, (target_bytes // (n_aligned * row_bytes)) // 8 * 8)
    else:
        block_b = 8
        block_n = max(8, (target_bytes // (8 * row_bytes)) // 8 * 8)

    if B >= 16:
        want_blocks = 4 if B >= 32 else 2
        cap = max(8, _round_up(-(-B // want_blocks), 8))
        block_b = min(block_b, cap)
    if block_b >= B:            # tiny batch: one exact block, no B padding
        block_b = B
    return block_b, block_n


def _make_kernel(n_true, n_padded):
    needs_mask = (n_padded != n_true)
    inv_n = 1.0 / float(n_true)

    def kernel(x_ref,
               w1, b1, w2, b2, w3, b3, w4, b4,
               w5t, b5c, wp1t, bp1c, wp2t, bp2c,
               o_ref, acc_ref):
        n_idx = pl.program_id(1)

        @pl.when(n_idx == 0)
        def _init():
            acc_ref[...] = jnp.zeros_like(acc_ref)

        bt, nt, r = x_ref.shape
        # Hidden MLP on the flattened (block_b*block_n, RAW) slab: one matmul per layer
        # for the whole block.  Compute/accumulation stays f32; only the x bytes streamed
        # from HBM may be bf16 (cast once here, in VMEM).
        h = x_ref[...].astype(jnp.float32).reshape(bt * nt, r)
        for w, b in ((w1, b1), (w2, b2), (w3, b3), (w4, b4)):
            h = jnp.maximum(
                jnp.dot(h, w[...], preferred_element_type=jnp.float32) + b[...], 0.0)

        # mean(h @ w5 + b5, over N) == mean(h, over N) @ w5 + b5 (layer 5 has no
        # activation): reduce only the 22-wide activations, accumulated across the
        # 'arbitrary' N grid axis in VMEM scratch.
        h3 = h.reshape(bt, nt, HID)
        if needs_mask:
            # zero rows whose global index >= true N (wrapper zero-pads, mask makes the
            # mean exact and immune to Pallas boundary padding)
            row = jax.lax.broadcasted_iota(jnp.int32, (1, nt, 1), 1) + n_idx * nt
            h3 = jnp.where(row < n_true, h3, 0.0)
        acc_ref[...] += jnp.sum(h3, axis=1)

        @pl.when(n_idx == pl.num_programs(1) - 1)
        def _finalize():
            # Transposed prediction head -> lane-dense (1, block_b) output store.
            m_t = acc_ref[...].T * inv_n                                      # (HID, bt)
            f_t = jnp.dot(w5t[...], m_t, preferred_element_type=jnp.float32) + b5c[...]
            p_t = jnp.maximum(
                jnp.dot(wp1t[...], f_t, preferred_element_type=jnp.float32) + bp1c[...],
                0.0)
            y_t = jnp.dot(wp2t[...], p_t, preferred_element_type=jnp.float32) + bp2c[...]
            o_ref[...] = jax.nn.sigmoid(y_t).reshape(1, 1, bt)

    return kernel


def meta_network_forward(x, params, *, block_b=None, block_n=None,
                         target_block_bytes=3 << 20):
    """x: (B, N, RAW), float32 or bfloat16 (pass bf16 straight from the producer to halve
    HBM traffic -- this wrapper never casts).  params: flat list of 14 arrays, weights
    stored (in, out), biases (1, out).  Returns (B, 1) float32."""
    B, N, R = x.shape
    assert R == RAW
    (w1, b1, w2, b2, w3, b3, w4, b4, w5, b5, wp1, bp1, wp2, bp2) = params

    # ---- block sizing: VMEM budget that accounts for N and dtype ----
    n_aligned = _round_up(N, 8)
    auto_b, auto_n = _pick_blocks(B, n_aligned, x.dtype.itemsize, target_block_bytes)
    block_b = block_b or auto_b
    block_n = block_n or auto_n
    assert block_n % 8 == 0, "block_n must be a multiple of 8 (sublane alignment)"

    n_b_blocks = -(-B // block_b)
    n_n_blocks = -(-n_aligned // block_n)
    b_pad = n_b_blocks * block_b
    n_pad = n_n_blocks * block_n
    if (b_pad, n_pad) != (B, N):
        # zero padding; padded-N rows are masked in-kernel, padded-B rows dropped below.
        x = jnp.pad(x, ((0, b_pad - B), (0, n_pad - N), (0, 0)))

    # ---- pre-transposed head weights (tiny, one-time) for the lane-dense output ----
    kernel_params = [w1, b1, w2, b2, w3, b3, w4, b4,
                     w5.T, b5.reshape(FEAT, 1),
                     wp1.T, bp1.reshape(PRED_HID, 1),
                     wp2.T, bp2.reshape(1, 1)]

    x_spec = pl.BlockSpec((block_b, block_n, RAW), lambda i, n: (i, n, 0))

    def const_spec(p):
        # Constant index map => weights/biases fetched once and VMEM-resident.
        # TODO(synk): pack the 14 params into one operand / single-buffer them to trim
        # per-step DMA descriptor bookkeeping (they total ~30 KB, so this is minor).
        return pl.BlockSpec(p.shape, lambda i, n, _nd=p.ndim: (0,) * _nd)

    out_spec = pl.BlockSpec((1, 1, block_b), lambda i, n: (i, 0, 0))

    # advisory cost hint for XLA's scheduler
    flops = (2 * b_pad * n_pad * (RAW * HID + 3 * HID * HID)
             + 2 * b_pad * (HID * FEAT + FEAT * PRED_HID + PRED_HID))
    bytes_accessed = (int(x.size) * x.dtype.itemsize
                      + sum(int(p.size) * p.dtype.itemsize for p in kernel_params)
                      + b_pad * 4)
    cost = pl.CostEstimate(flops=flops, transcendentals=b_pad,
                           bytes_accessed=bytes_accessed)

    # explicit scoped-VMEM budget: double-buffered x block + its f32 copy + a few live
    # 22-wide (lane-padded to 128) activation slabs + params; clamp under v7x's 64 MiB.
    x_blk = block_b * block_n * RAW * x.dtype.itemsize
    h_blk = block_b * block_n * 128 * 4
    p_bytes = sum(int(p.size) * p.dtype.itemsize for p in kernel_params)
    vmem_limit = int(min(max(2 * x_blk + block_b * block_n * RAW * 4
                             + 6 * h_blk + 2 * p_bytes + (2 << 20), 32 << 20), 48 << 20))

    out = pl.pallas_call(
        _make_kernel(N, n_pad),
        out_shape=jax.ShapeDtypeStruct((n_b_blocks, 1, block_b), jnp.float32),
        grid=(n_b_blocks, n_n_blocks),
        in_specs=[x_spec] + [const_spec(p) for p in kernel_params],
        out_specs=out_spec,
        scratch_shapes=[pltpu.VMEM((block_b, HID), jnp.float32)],
        compiler_params=pltpu.CompilerParams(
            dimension_semantics=("parallel", "arbitrary"),
            vmem_limit_bytes=vmem_limit),
        cost_estimate=cost,
    )(x, *kernel_params)

    return out.reshape(b_pad, 1)[:B]


# ---------------- deterministic parameter init (PyTorch-Linear-style) ----------------
def init_linear(key, fan_in, fan_out):
    kw, kb = jax.random.split(key)
    bound = 1.0 / float(np.sqrt(fan_in))
    w = jax.random.uniform(kw, (fan_in, fan_out), jnp.float32, -bound, bound)
    b = jax.random.uniform(kb, (1, fan_out), jnp.float32, -bound, bound)
    return w, b


def make_params():
    dims = [(RAW, HID), (HID, HID), (HID, HID), (HID, HID), (HID, FEAT),   # mlp_raw_to_feat
            (FEAT, PRED_HID), (PRED_HID, 1)]                               # mlp_feat_to_pred
    params = []
    key = jax.random.PRNGKey(1)
    for fan_in, fan_out in dims:
        key, sub = jax.random.split(key)
        w, b = init_linear(sub, fan_in, fan_out)
        params += [w, b]
    return params


# ---------------- pure-JAX reference (matches PyTorch op order) ----------------
def reference_forward(x, params):
    (w1, b1, w2, b2, w3, b3, w4, b4, w5, b5, wp1, bp1, wp2, bp2) = params

    def mlp1(h):
        for w, b in ((w1, b1), (w2, b2), (w3, b3), (w4, b4)):
            h = jnp.maximum(h @ w + b, 0.0)
        return h @ w5 + b5

    feats = jax.vmap(mlp1)(x)                 # (B, N, FEAT)
    m = jnp.mean(feats, axis=1)               # (B, FEAT)
    p = jnp.maximum(m @ wp1 + bp1, 0.0)
    p = p @ wp2 + bp2
    return jax.nn.sigmoid(p)                  # (B, 1)


if __name__ == "__main__":
    params = make_params()

    # 1) small aligned case, f32 input: tight tolerance.
    B, N = 2, 8
    x = jax.random.normal(jax.random.PRNGKey(0), (B, N, RAW), jnp.float32)
    out = jax.block_until_ready(meta_network_forward(x, params))
    ref = reference_forward(x, params)
    np.testing.assert_allclose(np.asarray(out), np.asarray(ref), atol=1e-3, rtol=1e-3)
    assert out.shape == (B, 1) and out.dtype == jnp.float32

    # 2) bf16 input already in HBM (cast upstream of the kernel, never in the wrapper):
    #    halves the streamed bytes of the HBM-bound input; accumulation stays f32.
    x_bf16 = x.astype(jnp.bfloat16)
    out_bf16 = jax.block_until_ready(meta_network_forward(x_bf16, params))
    np.testing.assert_allclose(np.asarray(out_bf16), np.asarray(ref), atol=3e-2, rtol=3e-2)

    # 3) non-multiple-of-8 N: exercises zero-padding + in-kernel row mask (true-N mean).
    B2, N2 = 4, 13
    x2 = jax.random.normal(jax.random.PRNGKey(1), (B2, N2, RAW), jnp.float32)
    out2 = jax.block_until_ready(meta_network_forward(x2, params))
    ref2 = reference_forward(x2, params)
    np.testing.assert_allclose(np.asarray(out2), np.asarray(ref2), atol=1e-3, rtol=1e-3)

    # 4) larger batch: exercises multi-block "parallel" B axis + B padding.
    B3, N3 = 40, 8
    x3 = jax.random.normal(jax.random.PRNGKey(2), (B3, N3, RAW), jnp.float32)
    out3 = jax.block_until_ready(meta_network_forward(x3, params))
    ref3 = reference_forward(x3, params)
    np.testing.assert_allclose(np.asarray(out3), np.asarray(ref3), atol=1e-3, rtol=1e-3)

    print("KERNEL_OK")
</pallas_src>

<mosaic_0001>
module attributes {stable_mosaic.version = 11 : i64} {
  func.func @kernel(%arg0: i32, %arg1: i32, %arg2: memref<2x8x200xf32, #tpu.memory_space<vmem>>, %arg3: memref<200x22xf32, #tpu.memory_space<vmem>>, %arg4: memref<1x22xf32, #tpu.memory_space<vmem>>, %arg5: memref<22x22xf32, #tpu.memory_space<vmem>>, %arg6: memref<1x22xf32, #tpu.memory_space<vmem>>, %arg7: memref<22x22xf32, #tpu.memory_space<vmem>>, %arg8: memref<1x22xf32, #tpu.memory_space<vmem>>, %arg9: memref<22x22xf32, #tpu.memory_space<vmem>>, %arg10: memref<1x22xf32, #tpu.memory_space<vmem>>, %arg11: memref<60x22xf32, #tpu.memory_space<vmem>>, %arg12: memref<60x1xf32, #tpu.memory_space<vmem>>, %arg13: memref<30x60xf32, #tpu.memory_space<vmem>>, %arg14: memref<30x1xf32, #tpu.memory_space<vmem>>, %arg15: memref<1x30xf32, #tpu.memory_space<vmem>>, %arg16: memref<1x1xf32, #tpu.memory_space<vmem>>, %arg17: memref<1x1x2xf32, #tpu.memory_space<vmem>>, %arg18: memref<2x22xf32, #tpu.memory_space<vmem>>) attributes {dimension_semantics = [#tpu.dimension_semantics<parallel>, #tpu.dimension_semantics<arbitrary>], iteration_bounds = array<i64: 1, 1>, scalar_prefetch = 0 : i64, scratch_operands = 1 : i64, tpu.core_type = #tpu.core_type<tc>, window_params = [{transform_indices = @transform_0, window_bounds = array<i64: 2, 8, 200>}, {pipeline_mode = #tpu.pipeline_mode<synchronous>, transform_indices = @transform_1, window_bounds = array<i64: 200, 22>}, {pipeline_mode = #tpu.pipeline_mode<synchronous>, transform_indices = @transform_2, window_bounds = array<i64: 1, 22>}, {pipeline_mode = #tpu.pipeline_mode<synchronous>, transform_indices = @transform_3, window_bounds = array<i64: 22, 22>}, {pipeline_mode = #tpu.pipeline_mode<synchronous>, transform_indices = @transform_4, window_bounds = array<i64: 1, 22>}, {pipeline_mode = #tpu.pipeline_mode<synchronous>, transform_indices = @transform_5, window_bounds = array<i64: 22, 22>}, {pipeline_mode = #tpu.pipeline_mode<synchronous>, transform_indices = @transform_6, window_bounds = array<i64: 1, 22>}, {pipeline_mode = #tpu.pipeline_mode<synchronous>, transform_indices = @transform_7, window_bounds = array<i64: 22, 22>}, {pipeline_mode = #tpu.pipeline_mode<synchronous>, transform_indices = @transform_8, window_bounds = array<i64: 1, 22>}, {pipeline_mode = #tpu.pipeline_mode<synchronous>, transform_indices = @transform_9, window_bounds = array<i64: 60, 22>}, {pipeline_mode = #tpu.pipeline_mode<synchronous>, transform_indices = @transform_10, window_bounds = array<i64: 60, 1>}, {pipeline_mode = #tpu.pipeline_mode<synchronous>, transform_indices = @transform_11, window_bounds = array<i64: 30, 60>}, {pipeline_mode = #tpu.pipeline_mode<synchronous>, transform_indices = @transform_12, window_bounds = array<i64: 30, 1>}, {pipeline_mode = #tpu.pipeline_mode<synchronous>, transform_indices = @transform_13, window_bounds = array<i64: 1, 30>}, {pipeline_mode = #tpu.pipeline_mode<synchronous>, transform_indices = @transform_14, window_bounds = array<i64: 1, 1>}, {transform_indices = @transform_15, window_bounds = array<i64: 1, 1, 2>}]} {
    %c0_i32 = arith.constant 0 : i32
    %0 = arith.cmpi eq, %arg1, %c0_i32 : i32
    %1 = arith.extui %0 : i1 to i32
    %c0_i32_0 = arith.constant 0 : i32
    %2 = arith.cmpi ne, %1, %c0_i32_0 : i32
    scf.if %2 {
      %cst_33 = arith.constant 0.000000e+00 : f32
      %41 = vector.broadcast %cst_33 : f32 to vector<2x22xf32>
      %c0_34 = arith.constant 0 : index
      %c0_35 = arith.constant 0 : index
      %42 = vector.load %arg18[%c0_34, %c0_35] : memref<2x22xf32, #tpu.memory_space<vmem>>, vector<2x22xf32>
      tpu.vector_store %arg18[%c0_34, %c0_35], %41 {strides = array<i32>} : memref<2x22xf32, #tpu.memory_space<vmem>>, vector<2x22xf32>,
    } else {
    }
    %c0 = arith.constant 0 : index
    %c0_1 = arith.constant 0 : index
    %c0_2 = arith.constant 0 : index
    %3 = vector.load %arg2[%c0, %c0_1, %c0_2] : memref<2x8x200xf32, #tpu.memory_space<vmem>>, vector<2x8x200xf32>
    %4 = vector.shape_cast %3 : vector<2x8x200xf32> to vector<16x200xf32>
    %c0_3 = arith.constant 0 : index
    %c0_4 = arith.constant 0 : index
    %5 = vector.load %arg3[%c0_3, %c0_4] : memref<200x22xf32, #tpu.memory_space<vmem>>, vector<200x22xf32>
    %cst = arith.constant dense<0.000000e+00> : vector<16x22xf32>
    %6 = tpu.matmul %4, %5, %cst {dimension_numbers = #tpu.dot_dimension_numbers<[1], [0], [0], [1], [0, 0, 1, 1], [], []>} : vector<16x200xf32>, vector<200x22xf32>, vector<16x22xf32> -> vector<16x22xf32>
    %c0_5 = arith.constant 0 : index
    %c0_6 = arith.constant 0 : index
    %7 = vector.load %arg4[%c0_5, %c0_6] : memref<1x22xf32, #tpu.memory_space<vmem>>, vector<1x22xf32>
    %8 = vector.broadcast %7 : vector<1x22xf32> to vector<16x22xf32>
    %9 = arith.addf %6, %8 : vector<16x22xf32>
    %cst_7 = arith.constant 0.000000e+00 : f32
    %10 = vector.broadcast %cst_7 : f32 to vector<16x22xf32>
    %11 = arith.maximumf %9, %10 : vector<16x22xf32>
    %c0_8 = arith.constant 0 : index
    %c0_9 = arith.constant 0 : index
    %12 = vector.load %arg5[%c0_8, %c0_9] : memref<22x22xf32, #tpu.memory_space<vmem>>, vector<22x22xf32>
    %cst_10 = arith.constant dense<0.000000e+00> : vector<16x22xf32>
    %13 = tpu.matmul %11, %12, %cst_10 {dimension_numbers = #tpu.dot_dimension_numbers<[1], [0], [0], [1], [0, 0, 1, 1], [], []>} : vector<16x22xf32>, vector<22x22xf32>, vector<16x22xf32> -> vector<16x22xf32>
    %c0_11 = arith.constant 0 : index
    %c0_12 = arith.constant 0 : index
    %14 = vector.load %arg6[%c0_11, %c0_12] : memref<1x22xf32, #tpu.memory_space<vmem>>, vector<1x22xf32>
    %15 = vector.broadcast %14 : vector<1x22xf32> to vector<16x22xf32>
    %16 = arith.addf %13, %15 : vector<16x22xf32>
    %cst_13 = arith.constant 0.000000e+00 : f32
    %17 = vector.broadcast %cst_13 : f32 to vector<16x22xf32>
    %18 = arith.maximumf %16, %17 : vector<16x22xf32>
    %c0_14 = arith.constant 0 : index
    %c0_15 = arith.constant 0 : index
    %19 = vector.load %arg7[%c0_14, %c0_15] : memref<22x22xf32, #tpu.memory_space<vmem>>, vector<22x22xf32>
    %cst_16 = arith.constant dense<0.000000e+00> : vector<16x22xf32>
    %20 = tpu.matmul %18, %19, %cst_16 {dimension_numbers = #tpu.dot_dimension_numbers<[1], [0], [0], [1], [0, 0, 1, 1], [], []>} : vector<16x22xf32>, vector<22x22xf32>, vector<16x22xf32> -> vector<16x22xf32>
    %c0_17 = arith.constant 0 : index
    %c0_18 = arith.constant 0 : index
    %21 = vector.load %arg8[%c0_17, %c0_18] : memref<1x22xf32, #tpu.memory_space<vmem>>, vector<1x22xf32>
    %22 = vector.broadcast %21 : vector<1x22xf32> to vector<16x22xf32>
    %23 = arith.addf %20, %22 : vector<16x22xf32>
    %cst_19 = arith.constant 0.000000e+00 : f32
    %24 = vector.broadcast %cst_19 : f32 to vector<16x22xf32>
    %25 = arith.maximumf %23, %24 : vector<16x22xf32>
    %c0_20 = arith.constant 0 : index
    %c0_21 = arith.constant 0 : index
    %26 = vector.load %arg9[%c0_20, %c0_21] : memref<22x22xf32, #tpu.memory_space<vmem>>, vector<22x22xf32>
    %cst_22 = arith.constant dense<0.000000e+00> : vector<16x22xf32>
    %27 = tpu.matmul %25, %26, %cst_22 {dimension_numbers = #tpu.dot_dimension_numbers<[1], [0], [0], [1], [0, 0, 1, 1], [], []>} : vector<16x22xf32>, vector<22x22xf32>, vector<16x22xf32> -> vector<16x22xf32>
    %c0_23 = arith.constant 0 : index
    %c0_24 = arith.constant 0 : index
    %28 = vector.load %arg10[%c0_23, %c0_24] : memref<1x22xf32, #tpu.memory_space<vmem>>, vector<1x22xf32>
    %29 = vector.broadcast %28 : vector<1x22xf32> to vector<16x22xf32>
    %30 = arith.addf %27, %29 : vector<16x22xf32>
    %cst_25 = arith.constant 0.000000e+00 : f32
    %31 = vector.broadcast %cst_25 : f32 to vector<16x22xf32>
    %32 = arith.maximumf %30, %31 : vector<16x22xf32>
    %33 = vector.shape_cast %32 : vector<16x22xf32> to vector<2x8x22xf32>
    %c0_26 = arith.constant 0 : index
    %c0_27 = arith.constant 0 : index
    %34 = vector.load %arg18[%c0_26, %c0_27] : memref<2x22xf32, #tpu.memory_space<vmem>>, vector<2x22xf32>
    %cst_28 = arith.constant dense<0.000000e+00> : vector<2x22xf32>
    %35 = vector.multi_reduction <add>, %33, %cst_28 [1] : vector<2x8x22xf32> to vector<2x22xf32>
    %36 = arith.addf %34, %35 : vector<2x22xf32>
    %c0_29 = arith.constant 0 : index
    %c0_30 = arith.constant 0 : index
    %37 = vector.load %arg18[%c0_29, %c0_30] : memref<2x22xf32, #tpu.memory_space<vmem>>, vector<2x22xf32>
    tpu.vector_store %arg18[%c0_29, %c0_30], %36 {strides = array<i32>} : memref<2x22xf32, #tpu.memory_space<vmem>>, vector<2x22xf32>,
    %c0_i32_31 = arith.constant 0 : i32
    %38 = arith.cmpi eq, %arg1, %c0_i32_31 : i32
    %39 = arith.extui %38 : i1 to i32
    %c0_i32_32 = arith.constant 0 : i32
    %40 = arith.cmpi ne, %39, %c0_i32_32 : i32
    scf.if %40 {
      %c0_33 = arith.constant 0 : index
      %c0_34 = arith.constant 0 : index
      %41 = vector.load %arg18[%c0_33, %c0_34] : memref<2x22xf32, #tpu.memory_space<vmem>>, vector<2x22xf32>
      %42 = tpu.transpose %41, [1, 0] : vector<2x22xf32> -> vector<22x2xf32>
      %cst_35 = arith.constant 1.250000e-01 : f32
      %43 = vector.broadcast %cst_35 : f32 to vector<22x2xf32>
      %44 = arith.mulf %42, %43 : vector<22x2xf32>
      %c0_36 = arith.constant 0 : index
      %c0_37 = arith.constant 0 : index
      %45 = vector.load %arg11[%c0_36, %c0_37] : memref<60x22xf32, #tpu.memory_space<vmem>>, vector<60x22xf32>
      %cst_38 = arith.constant dense<0.000000e+00> : vector<60x2xf32>
      %46 = tpu.matmul %45, %44, %cst_38 {dimension_numbers = #tpu.dot_dimension_numbers<[1], [0], [0], [1], [0, 0, 1, 1], [], []>} : vector<60x22xf32>, vector<22x2xf32>, vector<60x2xf32> -> vector<60x2xf32>
      %c0_39 = arith.constant 0 : index
      %c0_40 = arith.constant 0 : index
      %47 = vector.load %arg12[%c0_39, %c0_40] : memref<60x1xf32, #tpu.memory_space<vmem>>, vector<60x1xf32>
      %48 = vector.broadcast %47 : vector<60x1xf32> to vector<60x2xf32>
      %49 = arith.addf %46, %48 : vector<60x2xf32>
      %c0_41 = arith.constant 0 : index
      %c0_42 = arith.constant 0 : index
      %50 = vector.load %arg13[%c0_41, %c0_42] : memref<30x60xf32, #tpu.memory_space<vmem>>, vector<30x60xf32>
      %cst_43 = arith.constant dense<0.000000e+00> : vector<30x2xf32>
      %51 = tpu.matmul %50, %49, %cst_43 {dimension_numbers = #tpu.dot_dimension_numbers<[1], [0], [0], [1], [0, 0, 1, 1], [], []>} : vector<30x60xf32>, vector<60x2xf32>, vector<30x2xf32> -> vector<30x2xf32>
      %c0_44 = arith.constant 0 : index
      %c0_45 = arith.constant 0 : index
      %52 = vector.load %arg14[%c0_44, %c0_45] : memref<30x1xf32, #tpu.memory_space<vmem>>, vector<30x1xf32>
      %53 = vector.broadcast %52 : vector<30x1xf32> to vector<30x2xf32>
      %54 = arith.addf %51, %53 : vector<30x2xf32>
      %cst_46 = arith.constant 0.000000e+00 : f32
      %55 = vector.broadcast %cst_46 : f32 to vector<30x2xf32>
      %56 = arith.maximumf %54, %55 : vector<30x2xf32>
      %c0_47 = arith.constant 0 : index
      %c0_48 = arith.constant 0 : index
      %57 = vector.load %arg15[%c0_47, %c0_48] : memref<1x30xf32, #tpu.memory_space<vmem>>, vector<1x30xf32>
      %cst_49 = arith.constant dense<0.000000e+00> : vector<1x2xf32>
      %58 = tpu.matmul %57, %56, %cst_49 {dimension_numbers = #tpu.dot_dimension_numbers<[1], [0], [0], [1], [0, 0, 1, 1], [], []>} : vector<1x30xf32>, vector<30x2xf32>, vector<1x2xf32> -> vector<1x2xf32>
      %c0_50 = arith.constant 0 : index
      %c0_51 = arith.constant 0 : index
      %59 = vector.load %arg16[%c0_50, %c0_51] : memref<1x1xf32, #tpu.memory_space<vmem>>, vector<1x1xf32>
      %60 = vector.broadcast %59 : vector<1x1xf32> to vector<1x2xf32>
      %61 = arith.addf %58, %60 : vector<1x2xf32>
      %62 = arith.negf %61 : vector<1x2xf32>
      %63 = math.exp %62 : vector<1x2xf32>
      %cst_52 = arith.constant 1.000000e+00 : f32
      %64 = vector.broadcast %cst_52 : f32 to vector<1x2xf32>
      %65 = arith.addf %64, %63 : vector<1x2xf32>
      %66 = arith.divf %64, %65 : vector<1x2xf32>
      %67 = vector.shape_cast %66 : vector<1x2xf32> to vector<1x1x2xf32>
      %c0_53 = arith.constant 0 : index
      %c0_54 = arith.constant 0 : index
      %c0_55 = arith.constant 0 : index
      %68 = vector.load %arg17[%c0_53, %c0_54, %c0_55] : memref<1x1x2xf32, #tpu.memory_space<vmem>>, vector<1x1x2xf32>
      tpu.vector_store %arg17[%c0_53, %c0_54, %c0_55], %67 {strides = array<i32>} : memref<1x1x2xf32, #tpu.memory_space<vmem>>, vector<1x1x2xf32>,
    } else {
    }
    return
  }
  func.func @transform_0(%arg0: i32, %arg1: i32) -> (i32, i32, i32) {
    %c0_i32 = arith.constant 0 : i32
    %c0_i32_0 = arith.constant 0 : i32
    return %arg0, %arg1, %c0_i32 : i32, i32, i32
  }
  func.func @transform_1(%arg0: i32, %arg1: i32) -> (i32, i32) {
    %c0_i32 = arith.constant 0 : i32
    %c0_i32_0 = arith.constant 0 : i32
    %c0_i32_1 = arith.constant 0 : i32
    return %c0_i32, %c0_i32_0 : i32, i32
  }
  func.func @transform_2(%arg0: i32, %arg1: i32) -> (i32, i32) {
    %c0_i32 = arith.constant 0 : i32
    %c0_i32_0 = arith.constant 0 : i32
    %c0_i32_1 = arith.constant 0 : i32
    return %c0_i32, %c0_i32_0 : i32, i32
  }
  func.func @transform_3(%arg0: i32, %arg1: i32) -> (i32, i32) {
    %c0_i32 = arith.constant 0 : i32
    %c0_i32_0 = arith.constant 0 : i32
    %c0_i32_1 = arith.constant 0 : i32
    return %c0_i32, %c0_i32_0 : i32, i32
  }
  func.func @transform_4(%arg0: i32, %arg1: i32) -> (i32, i32) {
    %c0_i32 = arith.constant 0 : i32
    %c0_i32_0 = arith.constant 0 : i32
    %c0_i32_1 = arith.constant 0 : i32
    return %c0_i32, %c0_i32_0 : i32, i32
  }
  func.func @transform_5(%arg0: i32, %arg1: i32) -> (i32, i32) {
    %c0_i32 = arith.constant 0 : i32
    %c0_i32_0 = arith.constant 0 : i32
    %c0_i32_1 = arith.constant 0 : i32
    return %c0_i32, %c0_i32_0 : i32, i32
  }
  func.func @transform_6(%arg0: i32, %arg1: i32) -> (i32, i32) {
    %c0_i32 = arith.constant 0 : i32
    %c0_i32_0 = arith.constant 0 : i32
    %c0_i32_1 = arith.constant 0 : i32
    return %c0_i32, %c0_i32_0 : i32, i32
  }
  func.func @transform_7(%arg0: i32, %arg1: i32) -> (i32, i32) {
    %c0_i32 = arith.constant 0 : i32
    %c0_i32_0 = arith.constant 0 : i32
    %c0_i32_1 = arith.constant 0 : i32
    return %c0_i32, %c0_i32_0 : i32, i32
  }
  func.func @transform_8(%arg0: i32, %arg1: i32) -> (i32, i32) {
    %c0_i32 = arith.constant 0 : i32
    %c0_i32_0 = arith.constant 0 : i32
    %c0_i32_1 = arith.constant 0 : i32
    return %c0_i32, %c0_i32_0 : i32, i32
  }
  func.func @transform_9(%arg0: i32, %arg1: i32) -> (i32, i32) {
    %c0_i32 = arith.constant 0 : i32
    %c0_i32_0 = arith.constant 0 : i32
    %c0_i32_1 = arith.constant 0 : i32
    return %c0_i32, %c0_i32_0 : i32, i32
  }
  func.func @transform_10(%arg0: i32, %arg1: i32) -> (i32, i32) {
    %c0_i32 = arith.constant 0 : i32
    %c0_i32_0 = arith.constant 0 : i32
    %c0_i32_1 = arith.constant 0 : i32
    return %c0_i32, %c0_i32_0 : i32, i32
  }
  func.func @transform_11(%arg0: i32, %arg1: i32) -> (i32, i32) {
    %c0_i32 = arith.constant 0 : i32
    %c0_i32_0 = arith.constant 0 : i32
    %c0_i32_1 = arith.constant 0 : i32
    return %c0_i32, %c0_i32_0 : i32, i32
  }
  func.func @transform_12(%arg0: i32, %arg1: i32) -> (i32, i32) {
    %c0_i32 = arith.constant 0 : i32
    %c0_i32_0 = arith.constant 0 : i32
    %c0_i32_1 = arith.constant 0 : i32
    return %c0_i32, %c0_i32_0 : i32, i32
  }
  func.func @transform_13(%arg0: i32, %arg1: i32) -> (i32, i32) {
    %c0_i32 = arith.constant 0 : i32
    %c0_i32_0 = arith.constant 0 : i32
    %c0_i32_1 = arith.constant 0 : i32
    return %c0_i32, %c0_i32_0 : i32, i32
  }
  func.func @transform_14(%arg0: i32, %arg1: i32) -> (i32, i32) {
    %c0_i32 = arith.constant 0 : i32
    %c0_i32_0 = arith.constant 0 : i32
    %c0_i32_1 = arith.constant 0 : i32
    return %c0_i32, %c0_i32_0 : i32, i32
  }
  func.func @transform_15(%arg0: i32, %arg1: i32) -> (i32, i32, i32) {
    %c0_i32 = arith.constant 0 : i32
    %c0_i32_0 = arith.constant 0 : i32
    %c0_i32_1 = arith.constant 0 : i32
    return %arg0, %c0_i32, %c0_i32_0 : i32, i32, i32
  }
}

</mosaic_0001>

<bundles_post_ra>
// kernel: tpu_custom_call.1
= control target key start
LH: loop header
LB: loop body
LE: loop exit
PB: predicated region body
PF: predicated region fallthrough
CT: control target
= control target key end

     0   :  { %s1583_s0 = inlined_call_operand.vmem [shape: f32[2,8,200], index: 0, kind: input, shape index: {}]   ;;  %s1584_s1 = inlined_call_operand.vmem [shape: f32[200,22], index: 1, kind: input, shape index: {}]   ;;  %s1585_s2 = inlined_call_operand.vmem [shape: f32[1,22], index: 2, kind: input, shape index: {}]   ;;  %s1586_s3 = inlined_call_operand.vmem [shape: f32[22,22], index: 3, kind: input, shape index: {}]   ;;  %s1587_s4 = inlined_call_operand.vmem [shape: f32[1,22], index: 4, kind: input, shape index: {}]   ;;  %s1588_s5 = inlined_call_operand.vmem [shape: f32[22,22], index: 5, kind: input, shape index: {}]   ;;  %s1589_s6 = inlined_call_operand.vmem [shape: f32[1,22], index: 6, kind: input, shape index: {}]   ;;  %s1590_s7 = inlined_call_operand.vmem [shape: f32[22,22], index: 7, kind: input, shape index: {}]   ;;  %s1591_s8 = inlined_call_operand.vmem [shape: f32[1,22], index: 8, kind: input, shape index: {}]   ;;  %s1592_s9 = inlined_call_operand.vmem [shape: f32[60,22], index: 9, kind: input, shape index: {}]   ;;  %s1593_s10 = inlined_call_operand.vmem [shape: f32[60,1], index: 10, kind: input, shape index: {}]   ;;  %s1594_s11 = inlined_call_operand.vmem [shape: f32[30,60], index: 11, kind: input, shape index: {}]   ;;  %s1595_s12 = inlined_call_operand.vmem [shape: f32[30,1], index: 12, kind: input, shape index: {}]   ;;  %s1596_s13 = inlined_call_operand.vmem [shape: f32[1,30], index: 13, kind: input, shape index: {}]   ;;  %s1597_s14 = inlined_call_operand.<no memory space> [shape: f32[1,1], index: 14, kind: input, shape index: {}]   ;;  %s1598_s15 = inlined_call_operand.hbm [shape: f32[1,1,2], index: 15, kind: output, shape index: {}]  }
   0x1   :  { %v20_v0 = vstv %s1597_s14 }
   0x2   :  { %21 = vst [vmem:[#allocation3] sm:$0x1] %v20_v0 }
   0x3   :  { %v63_v1 = vld [vmem:[%s1584_s1] sm:$0xff]  ;;  %v64_v2 = vld [vmem:[%s1584_s1 + $0x8] sm:$0xff]  ;;  %v65_v3 = vld [vmem:[%s1584_s1 + $0x10] sm:$0xff]  ;;  %vm57_vm0 = vcmask 173056   ;;  %v1229_v4 = vmov 0.0|0.0   ;;  %v1230_v7 = vmov 0.0  }
   0x4   :  { %1116 = vmatprep.subr.bf16.mxu0 %v1229_v4  ;;  %v1117_v5 = vpack.c.bf16 %v64_v2, %v63_v1  ;;  %v66_v6 = vld [vmem:[%s1584_s1 + $0x18] sm:$0xff]  ;;  %58 = vst.msk [vmem:[#allocation2] sm:$0x3] %vm57_vm0, %v1230_v7  ;;  %v67_v9 = vld [vmem:[%s1584_s1 + $0x20] sm:$0xff]  ;;  %v68_v10 = vld [vmem:[%s1584_s1 + $0x28] sm:$0xff]  ;;  %vm95_vm1 = vcmask 588800  }
   0x5   :  { %v1120_v8 = vpack.c.bf16 %v66_v6, %v65_v3  ;;  %v1123_v11 = vpack.c.bf16 %v68_v10, %v67_v9  ;;  %v69_v12 = vld [vmem:[%s1584_s1 + $0x30] sm:$0xff]  ;;  %v70_v13 = vld [vmem:[%s1584_s1 + $0x38] sm:$0xff]  ;;  %v60_v14 = vld [vmem:[%s1583_s0 + $0x8] sm:$0xff] }
   0x6   :  { %1118 = vmatpush1.bf16.msra.mxu0 %v1117_v5  ;;  %964 = vmatprep.mubr.msk.f32.mxu0 %vm95_vm1, %v60_v14 }
   0x7   :  { %1119 = vmatprep.subr.bf16.mxu0 %v1229_v4 }
   0xa   :  { %1121 = vmatpush1.bf16.msra.mxu0 %v1120_v8 }
   0xb   :  { %1122 = vmatprep.subr.bf16.mxu0 %v1229_v4 }
   0xc   :  { %22 = vsyncpa [#allocation5], 0  ;;  %v1126_v15 = vpack.c.bf16 %v70_v13, %v69_v12  ;;  %v71_v16 = vld [vmem:[%s1584_s1 + $0x40] sm:$0xff]  ;;  %v72_v17 = vld [vmem:[%s1584_s1 + $0x48] sm:$0xff]  ;;  %vm196_vm2 = vcmask 1045504   ;;  %vm189_vm3 = vcmask 179200  }
   0xd   :  { %v1129_v18 = vpack.c.bf16 %v72_v17, %v71_v16  ;;  %v73_v19 = vld [vmem:[%s1584_s1 + $0x50] sm:$0xff]  ;;  %v74_v20 = vld [vmem:[%s1584_s1 + $0x58] sm:$0xff]  ;;  %v75_v22 = vld [vmem:[%s1584_s1 + $0x60] sm:$0xff]  ;;  %vm486_vm4 = vcmask 1041409   ;;  %vm747_vm5 = vcmask 490496   ;;  %vm760_vm6 = vcmask 1043456  }
   0xe   :  { %1124 = vmatpush1.bf16.msra.mxu0 %v1123_v11  ;;  %v1132_v21 = vpack.c.bf16 %v74_v20, %v73_v19  ;;  %v76_v23 = vld [vmem:[%s1584_s1 + $0x68] sm:$0xff]  ;;  %v77_v25 = vld [vmem:[%s1584_s1 + $0x70] sm:$0xff]  ;;  %v78_v26 = vld [vmem:[%s1584_s1 + $0x78] sm:$0xff]  ;;  %vm1232_vm7 = vmmov 1   ;;  %vm1233_vm9 = vmmov 0   ;;  %vm864_vm11 = vcmask 244736  }
   0xf   :  { %1125 = vmatprep.subr.bf16.mxu0 %v1229_v4  ;;  %v1135_v24 = vpack.c.bf16 %v76_v23, %v75_v22  ;;  %v1138_v27 = vpack.c.bf16 %v78_v26, %v77_v25  ;;  %v79_v28 = vld [vmem:[%s1584_s1 + $0x80] sm:$0xff]  ;;  %v80_v29 = vld [vmem:[%s1584_s1 + $0x88] sm:$0xff]  ;;  %v81_v31 = vld [vmem:[%s1584_s1 + $0x90] sm:$0xff]  ;;  %s1234_s29 = smov [#allocation4]   ;;  %vm947_vm12 = vcmask 8192  }
  0x10   :  { %v1141_v30 = vpack.c.bf16 %v80_v29, %v79_v28  ;;  %v82_v32 = vld [vmem:[%s1584_s1 + $0x98] sm:$0xff]  ;;  %v83_v34 = vld [vmem:[%s1584_s1 + $0xa0] sm:$0xff]  ;;  %v84_v35 = vld [vmem:[%s1584_s1 + $0xa8] sm:$0xff]  ;;  %s955_s30 = sshll.u32 %s1234_s29, 4  ;;  %s956_s30 = int_to_ptr.vmem [resolvable:$true] %s955_s30 }
  0x11   :  { %v1144_v33 = vpack.c.bf16 %v82_v32, %v81_v31  ;;  %v1147_v36 = vpack.c.bf16 %v84_v35, %v83_v34  ;;  %v85_v37 = vld [vmem:[%s1584_s1 + $0xb0] sm:$0xff]  ;;  %v86_v38 = vld [vmem:[%s1584_s1 + $0xb8] sm:$0xff]  ;;  %v87_v40 = vld [vmem:[%s1584_s1 + $0xc0] sm:$0xff]  ;;  %s1209_s1 = scalar_lea.vmem %s956_s30, 32  ;;  %p1210_p1 = scmp.lt.s32.totalorder %s956_s30, %s956_s30 }
  0x12   :  { %1127 = vmatpush1.bf16.msra.mxu0 %v1126_v15  ;;  %v1150_v39 = vpack.c.bf16 %v86_v38, %v85_v37  ;;  %v59_v41 = vld [vmem:[%s1583_s0] sm:$0xff]  ;;  %v62_v42 = vld [vmem:[%s1583_s0 + $0x18] sm:$0xff]  ;;  %v61_v43 = vld [vmem:[%s1583_s0 + $0x10] sm:$0xff] }
  0x13   :  { %1128 = vmatprep.subr.bf16.mxu0 %v1229_v4  ;;  %v179_v44 = vld [vmem:[%s1586_s3] sm:$0xff]  ;;  %v180_v45 = vld [vmem:[%s1586_s3 + $0x8] sm:$0xff]  ;;  %v181_v47 = vld [vmem:[%s1586_s3 + $0x10] sm:$0x3f] }
  0x14   :  { %v1152_v46 = vpack.c.bf16 %v180_v45, %v179_v44  ;;  %v963_v48 = vld [vmem:[%s1585_s2] ss:$0 sm:$0xff]  ;;  %v278_v58 = vld [vmem:[%s1588_s5 + $0x8] sm:$0xff]  ;;  %v279_v60 = vld [vmem:[%s1588_s5 + $0x10] sm:$0x3f]  ;;  %v1231_v44 = vmov 0  }
  0x15   :  { %v277_v57 = vld [vmem:[%s1588_s5] sm:$0xff]  ;;  %v374_v6 = vld [vmem:[%s1590_s7 + $0x8] sm:$0xff]  ;;  %v375_v9 = vld [vmem:[%s1590_s7 + $0x10] sm:$0x3f]  ;;  %1200 = vset.pattern.permute.xlu1 %v1231_v44 }
  0x16   :  { %1130 = vmatpush1.bf16.msra.mxu0 %v1129_v18  ;;  %1153 = vmatprep.subr.bf16.mxu1 %v1152_v46  ;;  %v1156_v59 = vpack.c.bf16 %v278_v58, %v277_v57  ;;  %v966_v61 = vld [vmem:[%s1587_s4] ss:$0 sm:$0xff]  ;;  %v541_v45 = vld [vmem:[%s1593_s10 + $0x10] sm:$0xff]  ;;  %vm1181_vm8 = vmpackc.low %vm760_vm6, %vm1232_vm7 }
  0x17   :  { %1131 = vmatprep.subr.bf16.mxu0 %v1229_v4  ;;  %1155 = vmatpush3.bf16.msra.mxu1 %v1152_v46  ;;  %v373_v5 = vld [vmem:[%s1590_s7] sm:$0xff]  ;;  %v542_v46 = vld [vmem:[%s1593_s10 + $0x18] sm:$0xff]  ;;  %vm1191_vm10 = vmpackc.low %vm196_vm2, %vm1232_vm7 }
  0x18   :  { %1042 = vmatprep.subr.msk.mxu1 %vm196_vm2, %v181_v47  ;;  %v1160_v8 = vpack.c.bf16 %v374_v6, %v373_v5  ;;  %v970_v10 = vld [vmem:[%s1589_s6] ss:$0 sm:$0xff]  ;;  %v536_v5 = vld [vmem:[%s1592_s9 + $0x28] sm:$0xff]  ;;  %v537_v6 = vld [vmem:[%s1592_s9 + $0x30] sm:$0xff] }
  0x19   :  { %v974_v17 = vld [vmem:[%s1591_s8] ss:$0 sm:$0xff] }
  0x1a   :  { %1133 = vmatpush1.bf16.msra.mxu0 %v1132_v21  ;;  %v469_v37 = vld [vmem:[#allocation2] sm:$0x3] }
  0x1b   :  { %1134 = vmatprep.subr.bf16.mxu0 %v1229_v4  ;;  %1043 = vmatpush3.msk.msra.mxu1 %vm196_vm2, %v181_v47  ;;  %v543_v47 = vld [vmem:[%s1593_s10 + $0x20] sm:$0xff] }
  0x1c   :  { %1157 = vmatprep.subr.bf16.mxu1 %v1156_v59 }
  0x1e   :  { %1136 = vmatpush1.bf16.msra.mxu0 %v1135_v24 }
  0x1f   :  { %1137 = vmatprep.subr.bf16.mxu0 %v1229_v4 }
  0x22   :  { %1139 = vmatpush1.bf16.msra.mxu0 %v1138_v27 }
  0x23   :  { %1140 = vmatprep.subr.bf16.mxu0 %v1229_v4 }
  0x26   :  { %1142 = vmatpush1.bf16.msra.mxu0 %v1141_v30 }
  0x27   :  { %1143 = vmatprep.subr.bf16.mxu0 %v1229_v4 }
  0x2a   :  { %1145 = vmatpush1.bf16.msra.mxu0 %v1144_v33 }
  0x2b   :  { %1146 = vmatprep.subr.bf16.mxu0 %v1229_v4 }
  0x2e   :  { %1148 = vmatpush1.bf16.msra.mxu0 %v1147_v36 }
  0x2f   :  { %1149 = vmatprep.subr.bf16.mxu0 %v1229_v4 }
  0x32   :  { %1151 = vmatpush1.bf16.msra.mxu0 %v1150_v39 }
  0x33   :  { %150 = vmatprep.subr.mxu0 %v1230_v7 }
  0x36   :  { %151 = vmatpush1.msra.mxu0 %v87_v40 }
  0x37   :  { %167 = vmatmul.mubr.f32.vlgmr.msra.gmra.mrb[0].mxu0 %v59_v41 }
  0x38   :  { %965 = vmatprep.mubr.msk.f32.mxu0 %vm95_vm1, %v62_v42  ;;  %v531_v42 = vld [vmem:[%s1592_s9] sm:$0xff] }
  0x3b   :  { %172 = vmatmul.mubr.f32.gmra.mrb[2].mxu0 %v61_v43  ;;  %v540_v43 = vld [vmem:[%s1593_s10 + $0x8] sm:$0xff] }
  0x3c   :  { %554 = vperm.xlu1 %1200, %v540_v43  }
  0x40   :  { %559 = vperm.xlu1 %1200, %v541_v45  }
  0x44   :  { %564 = vperm.xlu1 %1200, %v542_v46  }
  0x48   :  { %569 = vperm.xlu1 %1200, %v543_v47  }
 0x10a   :  { %v168_v49 = vpop.f32.mrb[0].mxu0 }
 0x10b   :  { %v169_v50 = vadd.f32 %v963_v48, %v168_v49  ;;  %v170_v51 = vpop.f32.mrb[1].mxu0  ;;  %v545_v49 = vld [vmem:[%s1593_s10 + $0x30] sm:$0xff] }
 0x10c   :  { %v546_v51 = vld [vmem:[%s1593_s10 + $0x38] sm:$0xf] }
 0x10d   :  { %v177_v52 = vmax.f32 %v169_v50, 0.0  ;;  %v539_v50 = vld [vmem:[%s1593_s10] sm:$0xff] }
 0x10e   :  { %v173_v53 = vpop.f32.mrb[2].mxu0 }
 0x10f   :  { %v174_v54 = vadd.f32 %v963_v48, %v173_v53  ;;  %v175_v55 = vpop.f32.mrb[3].mxu0  ;;  %1044 = vmatprep.mubr.msk.f32.mxu1 %vm189_vm3, %v177_v52  ;;  %v544_v48 = vld [vmem:[%s1593_s10 + $0x28] sm:$0xff]  ;;  %v723_v52 = vld [vmem:[%s1595_s12] sm:$0xff] }
 0x110   :  { %574 = vperm.xlu1 %1200, %v544_v48   ;;  %v724_v53 = vld [vmem:[%s1595_s12 + $0x8] sm:$0xff]  ;;  %v726_v55 = vld [vmem:[%s1595_s12 + $0x18] sm:$0x3f] }
 0x111   :  { %v178_v56 = vmax.f32 %v174_v54, 0.0  ;;  %v725_v54 = vld [vmem:[%s1595_s12 + $0x10] sm:$0xff] }
 0x113   :  { %1045 = vmatmul.mubr.msk.f32.vlgmr.msra.gmra.mrb[0].mxu1 %vm189_vm3, %v178_v56  ;;  %v854_v56 = vld [vmem:[#allocation3] sm:$0x1] }
 0x114   :  { %1159 = vmatpush3.bf16.msra.mxu1 %v1156_v59  ;;  %579 = vperm.xlu1 %1200, %v545_v49  }
 0x115   :  { %1051 = vmatprep.subr.msk.mxu1 %vm196_vm2, %v279_v60 }
 0x118   :  { %1052 = vmatpush3.msk.msra.mxu1 %vm196_vm2, %v279_v60  ;;  %584 = vperm.xlu1 %1200, %v546_v51  }
 0x119   :  { %1161 = vmatprep.subr.bf16.mxu1 %v1160_v8 }
 0x11c   :  { %729 = vperm.xlu1 %1200, %v723_v52  }
 0x120   :  { %734 = vperm.xlu1 %1200, %v724_v53  }
 0x124   :  { %739 = vperm.xlu1 %1200, %v725_v54  }
 0x128   :  { %744 = vperm.xlu1 %1200, %v726_v55  }
 0x12c   :  { %857 = vperm.xlu1 %1200, %v854_v56  }
 0x1e6   :  { %v1046_v62 = vpop.f32.mrb[0].mxu1 }
 0x1e7   :  { %v272_v63 = vadd.f32 %v1046_v62, %v966_v61  ;;  %v266_v0 = vpop.f32.mrb[1].mxu1 }
 0x1e8   :  { %v267_v1 = vadd.f32 %v966_v61, %v266_v0  ;;  %v532_v0 = vld [vmem:[%s1592_s9 + $0x8] sm:$0xff] }
 0x1e9   :  { %v276_v3 = vmax.f32 %v272_v63, 0.0 }
 0x1ea   :  { %v275_v2 = vmax.f32 %v267_v1, 0.0  ;;  %v533_v1 = vld [vmem:[%s1592_s9 + $0x10] sm:$0xff] }
 0x1ec   :  { %1053 = vmatprep.mubr.msk.f32.mxu1 %vm189_vm3, %v275_v2  ;;  %v534_v2 = vld [vmem:[%s1592_s9 + $0x18] sm:$0xff] }
 0x1ed   :  { %1054 = vmatmul.mubr.msk.f32.vlgmr.msra.gmra.mrb[2].mxu1 %vm189_vm3, %v276_v3  ;;  %v535_v3 = vld [vmem:[%s1592_s9 + $0x20] sm:$0xff] }
 0x1ee   :  { %1163 = vmatpush3.bf16.msra.mxu1 %v1160_v8  ;;  %v538_v8 = vld [vmem:[%s1592_s9 + $0x38] sm:$0xf] }
 0x1ef   :  { %1060 = vmatprep.subr.msk.mxu1 %vm196_vm2, %v375_v9 }
 0x1f2   :  { %1061 = vmatpush3.msk.msra.mxu1 %vm196_vm2, %v375_v9  ;;  %v719_v9 = vld [vmem:[%s1594_s11] sm:$0xff] }
 0x2c0   :  { %v1055_v11 = vpop.f32.mrb[2].mxu1 }
 0x2c1   :  { %v368_v12 = vadd.f32 %v1055_v11, %v970_v10  ;;  %v362_v13 = vpop.f32.mrb[3].mxu1 }
 0x2c2   :  { %v363_v14 = vadd.f32 %v970_v10, %v362_v13  ;;  %v555_v10 = vpop.permute.xlu1 %554 }
 0x2c3   :  { %v372_v16 = vmax.f32 %v368_v12, 0.0 }
 0x2c4   :  { %v371_v15 = vmax.f32 %v363_v14, 0.0 }
 0x2c6   :  { %1062 = vmatprep.mubr.msk.f32.mxu1 %vm189_vm3, %v371_v15  ;;  %v560_v11 = vpop.permute.xlu1 %559 }
 0x2c7   :  { %1063 = vmatmul.mubr.msk.f32.vlgmr.msra.gmra.mrb[4].mxu1 %vm189_vm3, %v372_v16 }
 0x2c8   :  { %1071 = vmatprep.mubr.msk.f32.mxu1 %vm189_vm3, %v531_v42 }
 0x2ca   :  { %v565_v12 = vpop.permute.xlu1 %564 }
 0x2ce   :  { %v570_v13 = vpop.permute.xlu1 %569 }
 0x2d2   :  { %v575_v15 = vpop.permute.xlu1 %574 }
 0x39a   :  { %v1064_v18 = vpop.f32.mrb[4].mxu1 }
 0x39b   :  { %v464_v19 = vadd.f32 %v1064_v18, %v974_v17  ;;  %v458_v20 = vpop.f32.mrb[5].mxu1 }
 0x39c   :  { %v459_v21 = vadd.f32 %v974_v17, %v458_v20 }
 0x39d   :  { %v468_v22 = vmax.f32 %v464_v19, 0.0 }
 0x39e   :  { %v467_v23 = vmax.f32 %v459_v21, 0.0 }
 0x39f   :  { %v477_v24 = vsel %vm189_vm3, %v468_v22, 0.0 }
 0x3a0   :  { %v478_v25 = vrot.slane %v477_v24, 4  ;;  %v470_v26 = vsel %vm189_vm3, %v467_v23, 0.0 }
 0x3a1   :  { %v471_v27 = vrot.slane %v470_v26, 4 }
 0x3a2   :  { %v479_v28 = vadd.f32 %v478_v25, %v477_v24  ;;  %v580_v24 = vpop.permute.xlu1 %579 }
 0x3a3   :  { %v472_v29 = vadd.f32 %v471_v27, %v470_v26 }
 0x3a4   :  { %v480_v30 = vrot.slane %v479_v28, 2 }
 0x3a5   :  { %v473_v31 = vrot.slane %v472_v29, 2 }
 0x3a6   :  { %v481_v32 = vadd.f32 %v480_v30, %v479_v28 }
 0x3a7   :  { %v474_v33 = vadd.f32 %v473_v31, %v472_v29  ;;  %v585_v31 = vpop.permute.xlu1 %584 }
 0x3a8   :  { %v482_v34 = vrot.slane %v481_v32, 1 }
 0x3a9   :  { %v475_v35 = vrot.slane %v474_v33, 1 }
 0x3aa   :  { %v483_v36 = vadd.f32 %v482_v34, %v481_v32 }
 0x3ab   :  { %v476_v38 = vadd.f32 %v475_v35, %v474_v33 }
 0x3ad   :  { %v487_v39 = vsel %vm486_vm4, %v483_v36, %v476_v38  ;;  %v720_v38 = vld [vmem:[%s1594_s11 + $0x8] sm:$0xff] }
 0x3ae   :  { %v489_v40 = vadd.f32 %v487_v39, %v469_v37  ;;  %v721_v39 = vld [vmem:[%s1594_s11 + $0x10] sm:$0xff] }
 0x3b0   :  { %491 = vst.msk [vmem:[#allocation2] sm:$0x3] %vm57_vm0, %v489_v40  ;;  %v722_v40 = vld [vmem:[%s1594_s11 + $0x18] sm:$0x3f] }
 0x3b7   :  { %v495_v41 = vld [vmem:[#allocation2] sm:$0x3] }
 0x3b8   :  { %496 = vxpose.xlu0.b32.start.end [1/1] (short) (narrow) %v495_v41, 24  ;;  %v730_v41 = vpop.permute.xlu1 %729 }
 0x3bc   :  { %v735_v42 = vpop.permute.xlu1 %734 }
 0x3c0   :  { %v740_v43 = vpop.permute.xlu1 %739 }
 0x3c4   :  { %v745_v49 = vpop.permute.xlu1 %744 }
 0x3e1   :  { %1199 = vset.pattern.permute.xlu0 %v1231_v44 }
 0x3e9   :  { %549 = vperm.xlu0 %1199, %v539_v50  }
 0x438   :  { %v512_v57 = vpop.trf.xlu0 }
 0x439   :  { %v528_v59 = vmul.f32 0.125, %v512_v57 }
 0x43c   :  { %v513_v58 = vpop.trf.xlu0 }
 0x43d   :  { %v529_v60 = vmul.f32 0.125, %v513_v58  ;;  %v853_v58 = vld [vmem:[%s1596_s13] sm:$0x1]  ;;  %s1205_s13 = scalar_lea.vmem %s956_s30, 16 }
 0x43e   :  { %p1206_p0 = scmp.ne.s32.totalorder %s956_s30, %s1205_s13  ;;  %p1211_p2 = scmp.lt.s32.totalorder %s1209_s1, %s1205_s13 }
 0x43f   :  { %v1164_v61 = vpack.c.bf16 %v529_v60, %v528_v59  ;;  %v860_v59 = vlaneseq }
 0x440   :  { %v514_v62 = vpop.trf.xlu0  ;;  %p1212_p3 = por %p1211_p2, %p1210_p1 }
 0x441   :  { %1165 = vmatprep.subr.bf16.mxu1 %v1164_v61  ;;  %v530_v63 = vmul.f32 0.125, %v514_v62  ;;  %v861_v60 = vshrl.u32 %v860_v59, 7  ;;  %v858_v62 = vpop.permute.xlu1 %857 }
 0x442   :  { %1167 = vmatpush3.bf16.msra.mxu1 %v1164_v61  ;;  %p1213_p4 = pnand %p1212_p3, %p1206_p0 }
 0x443   :  { %1069 = vmatprep.subr.msk.mxu1 %vm196_vm2, %v530_v63  ;;  %v862_v61 = vsub.s32 0, %v861_v60 }
 0x446   :  { %1070 = vmatpush3.msk.msra.mxu1 %vm196_vm2, %v530_v63  ;;  %v863_v63 = vrot.slane %v858_v62, %v862_v61 }
 0x447   :  { %1072 = vmatmul.mubr.msk.f32.vlgmr.msra.gmra.mrb[6].mxu1 %vm189_vm3, %v532_v0 }
 0x448   :  { %1074 = vmatprep.mubr.msk.f32.mxu1 %vm189_vm3, %v533_v1 }
 0x44b   :  { %1075 = vmatmul.mubr.msk.f32.gmra.mrb[8].mxu1 %vm189_vm3, %v534_v2 }
 0x44c   :  { %1077 = vmatprep.mubr.msk.f32.mxu1 %vm189_vm3, %v535_v3 }
 0x44f   :  { %1078 = vmatmul.mubr.msk.f32.gmra.mrb[10].mxu1 %vm189_vm3, %v536_v5 }
 0x450   :  { %1080 = vmatprep.mubr.msk.f32.mxu1 %vm189_vm3, %v537_v6 }
 0x453   :  { %1081 = vmatmul.mubr.msk.f32.gmra.mrb[12].mxu1 %vm189_vm3, %v538_v8 }
 0x454   :  { %1099 = vmatprep.mubr.msk.f32.mxu1 %vm747_vm5, %v719_v9 }
 0x468   :  { %v550_v14 = vpop.permute.xlu0 %549 }
 0x51a   :  { %v1073_v16 = vpop.f32.mrb[6].mxu1 }
 0x51b   :  { %v686_v17 = vadd.f32 %v1073_v16, %v555_v10  ;;  %v680_v18 = vpop.f32.mrb[7].mxu1 }
 0x51c   :  { %v681_v19 = vadd.f32 %v680_v18, %v550_v14 }
 0x51e   :  { %v1168_v20 = vpack.c.bf16 %v686_v17, %v681_v19  ;;  %v1076_v21 = vpop.f32.mrb[8].mxu1 }
 0x51f   :  { %v696_v22 = vadd.f32 %v1076_v21, %v565_v12  ;;  %v690_v23 = vpop.f32.mrb[9].mxu1 }
 0x520   :  { %v691_v25 = vadd.f32 %v690_v23, %v560_v11  ;;  %1169 = vmatprep.subr.bf16.mxu1 %v1168_v20 }
 0x521   :  { %1171 = vmatpush3.bf16.msra.mxu1 %v1168_v20 }
 0x522   :  { %v1172_v26 = vpack.c.bf16 %v696_v22, %v691_v25  ;;  %v1079_v27 = vpop.f32.mrb[10].mxu1 }
 0x523   :  { %v706_v28 = vadd.f32 %v1079_v27, %v575_v15  ;;  %v700_v29 = vpop.f32.mrb[11].mxu1 }
 0x524   :  { %v701_v30 = vadd.f32 %v700_v29, %v570_v13  ;;  %1173 = vmatprep.subr.bf16.mxu1 %v1172_v26 }
 0x525   :  { %1175 = vmatpush3.bf16.msra.mxu1 %v1172_v26 }
 0x526   :  { %v1176_v32 = vpack.c.bf16 %v706_v28, %v701_v30  ;;  %v1082_v33 = vpop.f32.mrb[12].mxu1 }
 0x527   :  { %v716_v34 = vadd.f32 %v1082_v33, %v585_v31  ;;  %v710_v35 = vpop.f32.mrb[13].mxu1 }
 0x528   :  { %v711_v36 = vadd.f32 %v710_v35, %v580_v24  ;;  %1177 = vmatprep.subr.bf16.mxu1 %v1176_v32 }
 0x529   :  { %1179 = vmatpush3.bf16.msra.mxu1 %v1176_v32 }
 0x52a   :  { %v1180_v37 = vpack.c.bf16 %v716_v34, %v711_v36 }
 0x52c   :  { %1182 = vmatprep.subr.msk.bf16.mxu1 %vm1181_vm8, %v1180_v37 }
 0x52d   :  { %1185 = vmatpush3.bf16.msk.msra.mxu1 %vm1181_vm8, %v1180_v37 }
 0x52e   :  { %1186 = vmatprep.subr.bf16.mxu1 %v1229_v4 }
 0x530   :  { %1100 = vmatmul.mubr.msk.f32.vlgmr.msra.gmra.mrb[14].mxu1 %vm747_vm5, %v720_v38 }
 0x531   :  { %1102 = vmatprep.mubr.msk.f32.mxu1 %vm747_vm5, %v721_v39 }
 0x534   :  { %1103 = vmatmul.mubr.msk.f32.gmra.mrb[16].mxu1 %vm747_vm5, %v722_v40 }
 0x535   :  { %1113 = vmatprep.mubr.msk.f32.mxu1 %vm1233_vm9, %v1230_v7 }
 0x603   :  { %v1101_v44 = vpop.f32.mrb[14].mxu1 }
 0x604   :  { %v836_v45 = vadd.f32 %v1101_v44, %v735_v42  ;;  %v830_v46 = vpop.f32.mrb[15].mxu1 }
 0x605   :  { %v831_v47 = vadd.f32 %v830_v46, %v730_v41 }
 0x606   :  { %v850_v48 = vmax.f32 %v836_v45, 0.0 }
 0x607   :  { %v849_v50 = vmax.f32 %v831_v47, 0.0  ;;  %v1104_v51 = vpop.f32.mrb[16].mxu1 }
 0x608   :  { %v846_v52 = vadd.f32 %v1104_v51, %v745_v49  ;;  %v840_v53 = vpop.f32.mrb[17].mxu1 }
 0x609   :  { %v1187_v54 = vpack.c.bf16 %v850_v48, %v849_v50  ;;  %v841_v55 = vadd.f32 %v840_v53, %v740_v43 }
 0x60a   :  { %v852_v56 = vmax.f32 %v846_v52, 0.0 }
 0x60b   :  { %v851_v57 = vmax.f32 %v841_v55, 0.0  ;;  %1188 = vmatpush3.bf16.msra.mxu1 %v1187_v54 }
 0x60c   :  { %1189 = vmatprep.subr.bf16.mxu1 %v1229_v4 }
 0x60d   :  { %v1190_v7 = vpack.c.bf16 %v852_v56, %v851_v57 }
 0x60f   :  { %1192 = vmatpush3.bf16.msk.msra.mxu1 %vm1191_vm10, %v1190_v7 }
 0x612   :  { %1114 = vmatmul.mubr.msk.f32.vlgmr.msra.gmra.mrb[18].mxu1 %vm864_vm11, %v853_v58 }
 0x6e5   :  { %v937_v0 = vpop.f32.mrb[18].mxu1 }
 0x6e6   :  { %v938_v1 = vadd.f32 %v937_v0, %v863_v63  ;;  %v1115_v2 = vpop.f32.mrb[19].mxu1 }
 0x6e8   :  { %v994_v3 = vmul.f32 -1.442695, %v938_v1 }
 0x6ea   :  { %1201 = vpow2.f32 %v994_v3 }
 0x6f4   :  { %v1202_v5 = vpop.eup %1201 }
 0x6f5   :  { %v944_v4 = vadd.f32 1.0, %v1202_v5 }
 0x6f7   :  { %1203 = vrcp.f32 %v944_v4 }
 0x701   :  { %v1204_v6 = vpop.eup %1203 }
 0x702   :  { %948 = vst.msk [vmem:[#allocation4] sm:$0x1] %vm947_vm12, %v1204_v6 }
 0x703   :  { %1216 = shalt.err (!%p1213_p4)
}
 0x704   :  { %s1217_s10 = scalar_lea.hbm %s1598_s15, 16 }
 0x705   :  { %p1218_p5 = scmp.ne.s32.totalorder %s1598_s15, %s1217_s10  ;;  %p1221_p6 = scmp.lt.u32.totalorder %s1217_s10, %s1598_s15 }
 0x707   :  { %p1223_p7 = pnand %p1221_p6, %p1218_p5 }
 0x709   :  { %1226 = shalt.err (!%p1223_p7)
}
 0x70a   :  { %958 = dma.vmem_to_hbm [thread:$0]  %s956_s30, 16, %s1598_s15, [#allocation5]  }
 0x70b   :  { %1227 = dma.done.wait [#allocation5], 16  }
 0x70c   :  { %1228 = vsyncadd [#allocation5], 4294967280 }
 0x70d   :  { %962 = vsyncpa [#allocation5], 1 }

</bundles_post_ra>
